<compile_context>
chip_gen: v5e
topology: v5e:2x2
jax: 0.10.0
libtpu: 0.0.40
codegen_flags: <defaults>
</compile_context>

<pallas_src>
import jax
import jax.numpy as jnp
from jax import lax
from jax.experimental import pallas as pl
from jax.experimental.pallas import tpu as pltpu


def _cdiv(a, b):
    return (a + b - 1) // b


def _round_up(x, m):
    return _cdiv(x, m) * m


def _sub_rows(d):
    # Rows per in-kernel chunk: keeps acc + alpha + msg-slice working set at
    # roughly 24 vregs regardless of D.
    return max(8, 64 // _cdiv(d, 128))


def aggregator_kernel(curr_ref, alpha_ref, msg_ref, out_ref):
    # curr_ref : (tile, D)    -- mailbox['curr_emb'][:, 0, :] (K axis squeezed by BlockSpec)
    # alpha_ref: (tile, K)
    # msg_ref  : (tile, K*D)  -- msg.reshape(N, K*D) block (lane-dense last dim)
    # out_ref  : (tile, D)
    tile, d = out_ref.shape
    k_dim = alpha_ref.shape[-1]
    sub = _sub_rows(d)
    n_chunks = tile // sub  # wrapper guarantees tile % sub == 0

    def chunk(c, carry):
        r = pl.multiple_of(c * sub, sub)
        rows = pl.ds(r, sub)
        # Load alpha once per chunk (not K narrow ref slices).
        alpha_c = alpha_ref[rows, :].astype(jnp.float32)           # (sub, K)
        # SumAggregator: accumulator starts from curr_emb, f32 accumulation.
        acc = curr_ref[rows, :].astype(jnp.float32)                # (sub, D)
        for k in range(k_dim):                                     # K is small: static unroll
            a_k = alpha_c[:, k:k + 1]                              # (sub, 1): one lane-broadcast per k
            m_k = msg_ref[rows, pl.ds(k * d, d)].astype(jnp.float32)
            acc = acc + a_k * m_k                                  # dense (sub, D) FMA
        out_ref[rows, :] = acc.astype(out_ref.dtype)
        return carry

    lax.fori_loop(0, n_chunks, chunk, 0)


def aggregator_forward(curr_emb_mailbox, alpha, msg, *, node_tile=1024):
    """Aggregator.forward (SumAggregator update). Returns {'h': (N, D)}."""
    N, K, D = msg.shape
    assert curr_emb_mailbox.shape[0] == N and curr_emb_mailbox.shape[2] == D
    assert alpha.shape == (N, K, 1)

    # Free, contiguous reshapes only -- no extra HBM passes over the inputs.
    msg_flat = jnp.reshape(msg, (N, K * D))
    alpha_flat = jnp.reshape(alpha, (N, K))

    sub = _sub_rows(D)
    tile = min(_round_up(node_tile, sub), _round_up(N, sub))
    grid = (_cdiv(N, tile),)

    itemsize = msg.dtype.itemsize
    cost = pl.CostEstimate(
        flops=2 * N * K * D,
        bytes_accessed=itemsize * (N * K * D + 2 * N * D + N * K),
        transcendentals=0,
    )

    alpha_spec = pl.BlockSpec((tile, K), lambda i: (i, 0))
    msg_spec = pl.BlockSpec((tile, K * D), lambda i: (i, 0))
    out_spec = pl.BlockSpec((tile, D), lambda i: (i, 0))

    def call(curr_operand, curr_spec):
        return pl.pallas_call(
            aggregator_kernel,
            out_shape=jax.ShapeDtypeStruct((N, D), msg.dtype),
            grid=grid,
            in_specs=[curr_spec, alpha_spec, msg_spec],
            out_specs=out_spec,
            compiler_params=pltpu.CompilerParams(
                dimension_semantics=("parallel",),
            ),
            cost_estimate=cost,
        )(curr_operand, alpha_flat, msg_flat)

    try:
        # Preferred path: DMA only the k=0 row of the mailbox straight from HBM
        # (K axis squeezed in the BlockSpec) -- no wrapper-side slice pass.
        out = call(
            curr_emb_mailbox,
            pl.BlockSpec((tile, None, D), lambda i: (i, 0, 0)),
        )
        out = jax.block_until_ready(out)
    except Exception:
        # Targeted fallback (keeps the script runnable if the squeezed middle-dim
        # block is rejected): materialize the k=0 slice with one small extra pass.
        out = call(
            curr_emb_mailbox[:, 0, :],
            pl.BlockSpec((tile, D), lambda i: (i, 0)),
        )
    return {"h": out}


def aggregator_reference(curr_emb_mailbox, alpha, msg):
    curr_emb = curr_emb_mailbox[:, 0, :]
    nei_msg = jnp.squeeze(
        jnp.einsum("nok,nkd->nod", jnp.transpose(alpha, (0, 2, 1)), msg), axis=1
    )
    return curr_emb + nei_msg


if __name__ == "__main__":
    # Small deterministic example: N not a multiple of the chunk/tile size
    # (exercises the ragged boundary block), K neighbors, D = emb_dim < 128
    # (exercises the masked-lane path).
    N, K, D = 300, 8, 32
    key = jax.random.PRNGKey(0)
    k1, k2, k3 = jax.random.split(key, 3)

    curr_emb_mailbox = jax.random.normal(k1, (N, K, D), dtype=jnp.float32)
    alpha = jax.nn.softmax(
        jax.random.normal(k2, (N, K, 1), dtype=jnp.float32), axis=1
    )
    msg = jax.random.normal(k3, (N, K, D), dtype=jnp.float32)

    out = aggregator_forward(curr_emb_mailbox, alpha, msg)
    h = jax.block_until_ready(out["h"])

    ref = aggregator_reference(curr_emb_mailbox, alpha, msg)
    assert h.shape == (N, D)
    assert jnp.allclose(h, ref, atol=1e-5, rtol=1e-5), "mismatch vs reference"

    print("KERNEL_OK")
</pallas_src>

<mosaic_0001>
module attributes {stable_mosaic.version = 11 : i64} {
  func.func @aggregator_kernel(%arg0: i32, %arg1: memref<320x32xf32, #tpu.memory_space<vmem>>, %arg2: memref<320x8xf32, #tpu.memory_space<vmem>>, %arg3: memref<320x256xf32, #tpu.memory_space<vmem>>, %arg4: memref<320x32xf32, #tpu.memory_space<vmem>>) attributes {dimension_semantics = [#tpu.dimension_semantics<parallel>], iteration_bounds = array<i64: 1>, scalar_prefetch = 0 : i64, scratch_operands = 0 : i64, tpu.core_type = #tpu.core_type<tc>, window_params = [{transform_indices = @transform_0, window_bounds = array<i64: 320, 32>}, {transform_indices = @transform_1, window_bounds = array<i64: 320, 8>}, {transform_indices = @transform_2, window_bounds = array<i64: 320, 256>}, {transform_indices = @transform_3, window_bounds = array<i64: 320, 32>}]} {
    %c0_i32 = arith.constant 0 : i32
    %c5_i32 = arith.constant 5 : i32
    %0 = arith.addi %c0_i32, %c5_i32 : i32
    %c1_i32 = arith.constant 1 : i32
    scf.for %arg5 = %c0_i32 to %0 step %c1_i32  : i32 {
      %c64_i32 = arith.constant 64 : i32
      %1 = arith.muli %arg5, %c64_i32 : i32
      %2 = tpu.assume_multiple %1, 64 : i32
      %3 = arith.index_cast %2 : i32 to index
      %c0 = arith.constant 0 : index
      %4 = vector.load %arg2[%3, %c0] : memref<320x8xf32, #tpu.memory_space<vmem>>, vector<64x8xf32>
      %5 = arith.index_cast %2 : i32 to index
      %c0_1 = arith.constant 0 : index
      %6 = vector.load %arg1[%5, %c0_1] : memref<320x32xf32, #tpu.memory_space<vmem>>, vector<64x32xf32>
      %7 = vector.extract_strided_slice %4 {offsets = [0, 0], sizes = [64, 1], strides = [1, 1]} : vector<64x8xf32> to vector<64x1xf32>
      %8 = arith.index_cast %2 : i32 to index
      %c0_2 = arith.constant 0 : index
      %9 = vector.load %arg3[%8, %c0_2] : memref<320x256xf32, #tpu.memory_space<vmem>>, vector<64x32xf32>
      %10 = vector.broadcast %7 : vector<64x1xf32> to vector<64x32xf32>
      %11 = arith.mulf %10, %9 : vector<64x32xf32>
      %12 = arith.addf %6, %11 : vector<64x32xf32>
      %13 = vector.extract_strided_slice %4 {offsets = [0, 1], sizes = [64, 1], strides = [1, 1]} : vector<64x8xf32> to vector<64x1xf32>
      %14 = arith.index_cast %2 : i32 to index
      %c32 = arith.constant 32 : index
      %15 = vector.load %arg3[%14, %c32] : memref<320x256xf32, #tpu.memory_space<vmem>>, vector<64x32xf32>
      %16 = vector.broadcast %13 : vector<64x1xf32> to vector<64x32xf32>
      %17 = arith.mulf %16, %15 : vector<64x32xf32>
      %18 = arith.addf %12, %17 : vector<64x32xf32>
      %19 = vector.extract_strided_slice %4 {offsets = [0, 2], sizes = [64, 1], strides = [1, 1]} : vector<64x8xf32> to vector<64x1xf32>
      %20 = arith.index_cast %2 : i32 to index
      %c64 = arith.constant 64 : index
      %21 = vector.load %arg3[%20, %c64] : memref<320x256xf32, #tpu.memory_space<vmem>>, vector<64x32xf32>
      %22 = vector.broadcast %19 : vector<64x1xf32> to vector<64x32xf32>
      %23 = arith.mulf %22, %21 : vector<64x32xf32>
      %24 = arith.addf %18, %23 : vector<64x32xf32>
      %25 = vector.extract_strided_slice %4 {offsets = [0, 3], sizes = [64, 1], strides = [1, 1]} : vector<64x8xf32> to vector<64x1xf32>
      %26 = arith.index_cast %2 : i32 to index
      %c96 = arith.constant 96 : index
      %27 = vector.load %arg3[%26, %c96] : memref<320x256xf32, #tpu.memory_space<vmem>>, vector<64x32xf32>
      %28 = vector.broadcast %25 : vector<64x1xf32> to vector<64x32xf32>
      %29 = arith.mulf %28, %27 : vector<64x32xf32>
      %30 = arith.addf %24, %29 : vector<64x32xf32>
      %31 = vector.extract_strided_slice %4 {offsets = [0, 4], sizes = [64, 1], strides = [1, 1]} : vector<64x8xf32> to vector<64x1xf32>
      %32 = arith.index_cast %2 : i32 to index
      %c128 = arith.constant 128 : index
      %33 = vector.load %arg3[%32, %c128] : memref<320x256xf32, #tpu.memory_space<vmem>>, vector<64x32xf32>
      %34 = vector.broadcast %31 : vector<64x1xf32> to vector<64x32xf32>
      %35 = arith.mulf %34, %33 : vector<64x32xf32>
      %36 = arith.addf %30, %35 : vector<64x32xf32>
      %37 = vector.extract_strided_slice %4 {offsets = [0, 5], sizes = [64, 1], strides = [1, 1]} : vector<64x8xf32> to vector<64x1xf32>
      %38 = arith.index_cast %2 : i32 to index
      %c160 = arith.constant 160 : index
      %39 = vector.load %arg3[%38, %c160] : memref<320x256xf32, #tpu.memory_space<vmem>>, vector<64x32xf32>
      %40 = vector.broadcast %37 : vector<64x1xf32> to vector<64x32xf32>
      %41 = arith.mulf %40, %39 : vector<64x32xf32>
      %42 = arith.addf %36, %41 : vector<64x32xf32>
      %43 = vector.extract_strided_slice %4 {offsets = [0, 6], sizes = [64, 1], strides = [1, 1]} : vector<64x8xf32> to vector<64x1xf32>
      %44 = arith.index_cast %2 : i32 to index
      %c192 = arith.constant 192 : index
      %45 = vector.load %arg3[%44, %c192] : memref<320x256xf32, #tpu.memory_space<vmem>>, vector<64x32xf32>
      %46 = vector.broadcast %43 : vector<64x1xf32> to vector<64x32xf32>
      %47 = arith.mulf %46, %45 : vector<64x32xf32>
      %48 = arith.addf %42, %47 : vector<64x32xf32>
      %49 = vector.extract_strided_slice %4 {offsets = [0, 7], sizes = [64, 1], strides = [1, 1]} : vector<64x8xf32> to vector<64x1xf32>
      %50 = arith.index_cast %2 : i32 to index
      %c224 = arith.constant 224 : index
      %51 = vector.load %arg3[%50, %c224] : memref<320x256xf32, #tpu.memory_space<vmem>>, vector<64x32xf32>
      %52 = vector.broadcast %49 : vector<64x1xf32> to vector<64x32xf32>
      %53 = arith.mulf %52, %51 : vector<64x32xf32>
      %54 = arith.addf %48, %53 : vector<64x32xf32>
      %55 = arith.index_cast %2 : i32 to index
      %c0_3 = arith.constant 0 : index
      %56 = vector.load %arg4[%55, %c0_3] : memref<320x32xf32, #tpu.memory_space<vmem>>, vector<64x32xf32>
      tpu.vector_store %arg4[%55, %c0_3], %54 {strides = array<i32>} : memref<320x32xf32, #tpu.memory_space<vmem>>, vector<64x32xf32>,
    }
    %c5_i32_0 = arith.constant 5 : i32
    return
  }
  func.func @transform_0(%arg0: i32) -> (i32, i32) {
    %c0_i32 = arith.constant 0 : i32
    %c0_i32_0 = arith.constant 0 : i32
    return %arg0, %c0_i32 : i32, i32
  }
  func.func @transform_1(%arg0: i32) -> (i32, i32) {
    %c0_i32 = arith.constant 0 : i32
    %c0_i32_0 = arith.constant 0 : i32
    return %arg0, %c0_i32 : i32, i32
  }
  func.func @transform_2(%arg0: i32) -> (i32, i32) {
    %c0_i32 = arith.constant 0 : i32
    %c0_i32_0 = arith.constant 0 : i32
    return %arg0, %c0_i32 : i32, i32
  }
  func.func @transform_3(%arg0: i32) -> (i32, i32) {
    %c0_i32 = arith.constant 0 : i32
    %c0_i32_0 = arith.constant 0 : i32
    return %arg0, %c0_i32 : i32, i32
  }
}

</mosaic_0001>

<bundles_post_ra>
// kernel: tpu_custom_call.1
= control target key start
LH: loop header
LB: loop body
LE: loop exit
PB: predicated region body
PF: predicated region fallthrough
CT: control target
= control target key end

     0   :  { %s942_s12 = smov 0   ;;  %s1394_s0 = inlined_call_operand.vmem [shape: f32[300,32], index: 0, kind: input, shape index: {}]   ;;  %s1395_s1 = inlined_call_operand.vmem [shape: f32[300,8], index: 1, kind: input, shape index: {}]   ;;  %s1396_s2 = inlined_call_operand.vmem [shape: f32[300,256], index: 2, kind: input, shape index: {}]   ;;  %s1397_s3 = inlined_call_operand.vmem [shape: f32[300,32], index: 3, kind: output, shape index: {}]  }
   0x1 LB: > { %v911_v0 = vmov 0   ;;  %s948_s13 = sshll.u32 %s909_s12, 6  ;;  %v912_v9 = vmov 1   ;;  %v913_v10 = vmov 2   ;;  %v914_v11 = vmov 3   ;;  %s915_s25 = smov 96   ;;  %s909_s12 = sphi %s942_s12, %s19_s12  }
   0x2   : > { %881 = vset.pattern.permute.xlu2 %v911_v0  ;;  %880 = vset.pattern.permute.xlu1 %v911_v0  ;;  %s21_s16 = scalar_lea.vmem %s1395_s1, %s948_s13  ;;  %s39_s17 = sshra.s32 %s948_s13, 3  ;;  %vm645_vm0 = vcmask 261120  }
   0x3   : > { %879 = vset.pattern.permute.xlu0 %v911_v0  ;;  %v954_v1 = vld [vmem:[%s21_s16 + $0x20] sm:$0xff]  ;;  %v956_v2 = vld [vmem:[%s21_s16 + $0x10] sm:$0xff]  ;;  %v963_v4 = vld [vmem:[%s21_s16 + $0x28] sm:$0xff]  ;;  %s859_s18 = sshll.u32 %s39_s17, 4  ;;  %s1013_s24 = scalar_lea.vmem %s1394_s0, %s948_s13 }
   0x4   : > { %v958_v3 = vld [vmem:[%s21_s16] sm:$0xff]  ;;  %74 = vperm.xlu2 %881, %v954_v1   ;;  %64 = vperm.xlu1 %880, %v956_v2   ;;  %v965_v5 = vld [vmem:[%s21_s16 + $0x18] sm:$0xff]  ;;  %v967_v6 = vld [vmem:[%s21_s16 + $0x8] sm:$0xff]  ;;  %s1003_s21 = scalar_lea.vmem %s1396_s2, %s859_s18  ;;  %s916_s26 = smov 64  }
   0x5   : > { %54 = vperm.xlu0 %879, %v958_v3   ;;  %v972_v7 = vld [vmem:[%s21_s16 + $0x38] sm:$0xff]  ;;  %v974_v8 = vld [vmem:[%s21_s16 + $0x30] sm:$0xff]  ;;  %v1006_v12 = vld [vmem:[%s1003_s21 + $0x40] sm:$0xff]  ;;  %s917_s27 = smov 32   ;;  %s644_s28 = scalar_lea.vmem [#allocation2], %s948_s13 }
   0x6   : > { %v35_v15 = vld [vmem:[%s1013_s24 + $0x20] sm:$0xff]  ;;  %v1029_v23 = vld [vmem:[%s1003_s21 + $0x30] sm:$0xff]  ;;  %v34_v32 = vld [vmem:[%s1013_s24 + $0x18] sm:$0xff]  ;;  %s19_s12 = sadd.s32 1, %s909_s12  }
   0x7   : > { %v1021_v18 = vld [vmem:[%s1003_s21] sm:$0xff]  ;;  %v1047_v36 = vld [vmem:[%s1003_s21 + $0x70] sm:$0xff]  ;;  %v38_v39 = vld [vmem:[%s1013_s24 + $0x38] sm:$0xff]  ;;  %p16_p0 = scmp.ge.s32.totalorder %s19_s12, 5  }
   0x8   : > { %v1026_v21 = vld [vmem:[%s1003_s21 + $0x20] sm:$0xff]  ;;  %v37_v42 = vld [vmem:[%s1013_s24 + $0x30] sm:$0xff] }
   0x9   : > { %v31_v26 = vld [vmem:[%s1013_s24] sm:$0xff]  ;;  %v1061_v47 = vld [vmem:[%s1003_s21 + $0x10] sm:$0xff] }
   0xa   : > { %v1050_v37 = vld [vmem:[%s1003_s21 + $0x60] sm:$0xff]  ;;  %v1068_v52 = vld [vmem:[%s1003_s21 + $0x50] sm:$0xff] }
   0xc   : > { %79 = vperm.xlu2 %881, %v963_v4   ;;  %69 = vperm.xlu1 %880, %v965_v5  }
   0xd   : > { %59 = vperm.xlu0 %879, %v967_v6  }
  0x14   : > { %882 = vset.pattern.permute.xlu2 %v912_v9  ;;  %89 = vperm.xlu1 %880, %v972_v7  }
  0x15   : > { %84 = vperm.xlu0 %879, %v974_v8   ;;  %109 = vperm.xlu2 %882, %v958_v3  }
  0x1c   : > { %884 = vset.pattern.permute.xlu1 %v912_v9 }
  0x1d   : > { %883 = vset.pattern.permute.xlu0 %v912_v9  ;;  %117 = vperm.xlu1 %884, %v956_v2  }
  0x1e   : > { %121 = vperm.xlu2 %882, %v965_v5   ;;  %113 = vperm.xlu0 %883, %v967_v6  }
  0x25   : > { %125 = vperm.xlu1 %884, %v954_v1  }
  0x26   : > { %133 = vperm.xlu0 %883, %v974_v8   ;;  %129 = vperm.xlu2 %882, %v963_v4  }
  0x2d   : > { %137 = vperm.xlu1 %884, %v972_v7  }
  0x2e   : > { %887 = vset.pattern.permute.xlu0 %v913_v10  ;;  %886 = vset.pattern.permute.xlu2 %v913_v10 }
  0x2f   : > { %197 = vperm.xlu0 %887, %v956_v2   ;;  %193 = vperm.xlu2 %886, %v967_v6  }
  0x35   : > { %885 = vset.pattern.permute.xlu1 %v913_v10 }
  0x36   : > { %189 = vperm.xlu1 %885, %v958_v3  }
  0x37   : > { %217 = vperm.xlu0 %887, %v972_v7   ;;  %205 = vperm.xlu2 %886, %v954_v1  }
  0x3e   : > { %201 = vperm.xlu1 %885, %v965_v5  }
  0x3f   : > { %213 = vperm.xlu2 %886, %v974_v8   ;;  %888 = vset.pattern.permute.xlu0 %v914_v11 }
  0x40   : > { %269 = vperm.xlu0 %888, %v958_v3  }
  0x46   : > { %209 = vperm.xlu1 %885, %v963_v4  }
  0x47   : > { %890 = vset.pattern.permute.xlu2 %v914_v11 }
  0x48   : > { %277 = vperm.xlu2 %890, %v956_v2  }
  0x4e   : > { %889 = vset.pattern.permute.xlu1 %v914_v11 }
  0x4f   : > { %273 = vperm.xlu1 %889, %v967_v6  }
  0x50   : > { %285 = vperm.xlu2 %890, %v954_v1  }
  0x57   : > { %281 = vperm.xlu1 %889, %v965_v5  }
  0x5e   : > { %v75_v13 = vpop.permute.xlu2 %74 }
  0x5f   : > { %v96_v14 = vmul.f32 %v75_v13, %v1006_v12 }
  0x61   : > { %v1016_v16 = vadd.f32 %v96_v14, %v35_v15 }
  0x66   : > { %v1018_v17 = vpop.permute.xlu2 %79 }
  0x6f   : > { %v110_v19 = vpop.permute.xlu2 %109 }
  0x70   : > { %v140_v20 = vmul.f32 %v110_v19, %v1021_v18 }
  0x72   : > { %156 = vrot.lane.b32.xlu2 %v140_v20, %s915_s25 }
  0x76   : > { %v65_v22 = vpop.permute.xlu1 %64 }
  0x77   : > { %v1032_v24 = vmul.f32 %v65_v22, %v1026_v21  ;;  %v55_v25 = vpop.permute.xlu0 %54 }
  0x78   : > { %v122_v27 = vpop.permute.xlu2 %121  ;;  %v92_v28 = vmul.f32 %v55_v25, %v1021_v18 }
  0x79   : > { %v143_v29 = vmul.f32 %v122_v27, %v1029_v23 }
  0x7a   : > { %v1037_v30 = vadd.f32 %v92_v28, %v31_v26 }
  0x7b   : > { %162 = vrot.lane.b32.xlu2 %v143_v29, %s915_s25 }
  0x7e   : > { %v70_v31 = vpop.permute.xlu1 %69 }
  0x7f   : > { %v95_v33 = vmul.f32 %v70_v31, %v1029_v23  ;;  %v1042_v34 = vpop.permute.xlu0 %59 }
  0x80   : > { %v130_v51 = vpop.permute.xlu2 %129 }
  0x81   : > { %v1044_v35 = vadd.f32 %v95_v33, %v34_v32  ;;  %v145_v54 = vmul.f32 %v130_v51, %v1068_v52 }
  0x86   : > { %v90_v38 = vpop.permute.xlu1 %89 }
  0x87   : > { %v99_v40 = vmul.f32 %v90_v38, %v1047_v36  ;;  %v85_v41 = vpop.permute.xlu0 %84 }
  0x88   : > { %v98_v43 = vmul.f32 %v85_v41, %v1050_v37 }
  0x89   : > { %v1056_v44 = vadd.f32 %v99_v40, %v38_v39  ;;  %v194_v58 = vpop.permute.xlu2 %193 }
  0x8a   : > { %v1058_v45 = vadd.f32 %v98_v43, %v37_v42  ;;  %v221_v59 = vmul.f32 %v194_v58, %v1061_v47  ;;  %v36_v58 = vld [vmem:[%s1013_s24 + $0x28] sm:$0xff] }
  0x8f   : > { %v118_v46 = vpop.permute.xlu1 %117 }
  0x90   : > { %v142_v48 = vmul.f32 %v118_v46, %v1026_v21  ;;  %v114_v49 = vpop.permute.xlu0 %113 }
  0x91   : > { %v141_v50 = vmul.f32 %v114_v49, %v1061_v47  ;;  %v206_v63 = vpop.permute.xlu2 %205 }
  0x92   : > { %160 = vrot.lane.b32.xlu1 %v142_v48, %s915_s25  ;;  %v224_v0 = vmul.f32 %v206_v63, %v1006_v12 }
  0x93   : > { %158 = vrot.lane.b32.xlu0 %v141_v50, %s915_s25  ;;  %v918_v50 = vmov 4  }
  0x97   : > { %v126_v53 = vpop.permute.xlu1 %125 }
  0x98   : > { %v144_v55 = vmul.f32 %v126_v53, %v1006_v12  ;;  %v134_v56 = vpop.permute.xlu0 %133 }
  0x99   : > { %v146_v57 = vmul.f32 %v134_v56, %v1050_v37  ;;  %v214_v15 = vpop.permute.xlu2 %213 }
  0x9a   : > { %166 = vrot.lane.b32.xlu1 %v145_v54, %s915_s25  ;;  %v226_v27 = vmul.f32 %v214_v15, %v1050_v37 }
  0x9b   : > { %164 = vrot.lane.b32.xlu0 %v144_v55, %s915_s25  ;;  %168 = vrot.lane.b32.xlu2 %v146_v57, %s915_s25 }
  0x9f   : > { %v138_v60 = vpop.permute.xlu1 %137 }
  0xa0   : > { %v147_v61 = vmul.f32 %v138_v60, %v1047_v36 }
  0xa1   : > { %v198_v62 = vpop.permute.xlu0 %197 }
  0xa2   : > { %v222_v9 = vmul.f32 %v198_v62, %v1026_v21  ;;  %v278_v25 = vpop.permute.xlu2 %277 }
  0xa3   : > { %170 = vrot.lane.b32.xlu0 %v147_v61, %s915_s25  ;;  %238 = vrot.lane.b32.xlu2 %v221_v59, %s916_s26  ;;  %v302_v28 = vmul.f32 %v278_v25, %v1026_v21 }
  0xa8   : > { %v190_v10 = vpop.permute.xlu1 %189 }
  0xa9   : > { %v220_v11 = vmul.f32 %v190_v10, %v1021_v18  ;;  %v218_v13 = vpop.permute.xlu0 %217 }
  0xaa   : > { %v227_v14 = vmul.f32 %v218_v13, %v1047_v36  ;;  %v286_v29 = vpop.permute.xlu2 %285 }
  0xab   : > { %244 = vrot.lane.b32.xlu2 %v224_v0, %s916_s26  ;;  %240 = vrot.lane.b32.xlu0 %v222_v9, %s916_s26  ;;  %v304_v42 = vmul.f32 %v286_v29, %v1006_v12  ;;  %v32_v12 = vld [vmem:[%s1013_s24 + $0x8] sm:$0xff] }
  0xac   : > { %236 = vrot.lane.b32.xlu1 %v220_v11, %s916_s26 }
  0xb0   : > { %v202_v19 = vpop.permute.xlu1 %201 }
  0xb1   : > { %v223_v20 = vmul.f32 %v202_v19, %v1029_v23 }
  0xb2   : > { %v270_v32 = vpop.permute.xlu0 %269 }
  0xb3   : > { %250 = vrot.lane.b32.xlu2 %v227_v14, %s916_s26  ;;  %v300_v33 = vmul.f32 %v270_v32, %v1021_v18 }
  0xb4   : > { %242 = vrot.lane.b32.xlu1 %v223_v20, %s916_s26 }
  0xb8   : > { %v210_v22 = vpop.permute.xlu1 %209 }
  0xb9   : > { %v225_v26 = vmul.f32 %v210_v22, %v1068_v52 }
  0xbb   : > { %297 = vperm.xlu2 %890, %v972_v7   ;;  %246 = vrot.lane.b32.xlu0 %v225_v26, %s916_s26 }
  0xbc   : > { %248 = vrot.lane.b32.xlu1 %v226_v27, %s916_s26 }
  0xc1   : > { %v274_v31 = vpop.permute.xlu1 %273 }
  0xc2   : > { %v301_v38 = vmul.f32 %v274_v31, %v1061_v47  ;;  %v919_v31 = vmov 5  }
  0xc3   : > { %289 = vperm.xlu0 %888, %v963_v4   ;;  %320 = vrot.lane.b32.xlu2 %v302_v28, %s917_s27 }
  0xc4   : > { %293 = vperm.xlu1 %889, %v974_v8   ;;  %891 = vset.pattern.permute.xlu2 %v918_v50 }
  0xc9   : > { %v282_v21 = vpop.permute.xlu1 %281 }
  0xca   : > { %v303_v41 = vmul.f32 %v282_v21, %v1029_v23  ;;  %v93_v23 = vmul.f32 %v1042_v34, %v1061_v47 }
  0xcb   : > { %316 = vrot.lane.b32.xlu0 %v300_v33, %s917_s27 }
  0xcc   : > { %318 = vrot.lane.b32.xlu1 %v301_v38, %s917_s27  ;;  %v157_v39 = vpop.permute.xlu2 %156  ;;  %892 = vset.pattern.permute.xlu0 %v918_v50  ;;  %v101_v54 = vadd.f32 %v93_v23, %v32_v12  ;;  %v1156_v23 = vld [vmem:[%s1003_s21 + $0x8] sm:$0xff] }
  0xcd   : > { %v180_v40 = vadd.f32 %v157_v39, %v1037_v30  ;;  %893 = vset.pattern.permute.xlu1 %v918_v50  ;;  %v33_v30 = vld [vmem:[%s1013_s24 + $0x10] sm:$0xff]  ;;  %v1153_v50 = vld [vmem:[%s1003_s21 + $0x48] sm:$0xff] }
  0xce   : > { %v102_v51 = vadd.f32 %v1032_v24, %v33_v30 }
  0xd3   : > { %322 = vrot.lane.b32.xlu0 %v303_v41, %s917_s27  ;;  %v1147_v41 = vld [vmem:[%s1003_s21 + $0x28] sm:$0xff] }
  0xd4   : > { %324 = vrot.lane.b32.xlu1 %v304_v42, %s917_s27 }
  0xd5   : > { %v163_v18 = vpop.permute.xlu2 %162 }
  0xd6   : > { %v183_v43 = vadd.f32 %v163_v18, %v1044_v35 }
  0xf5   : > { %v169_v46 = vpop.permute.xlu2 %168 }
  0xf6   : > { %v186_v48 = vadd.f32 %v169_v46, %v1058_v45  ;;  %v97_v45 = vmul.f32 %v1018_v17, %v1068_v52 }
  0xf8   : > { %v105_v60 = vadd.f32 %v97_v45, %v36_v58  ;;  %v1168_v45 = vld [vmem:[%s1003_s21 + $0x38] sm:$0xff] }
  0xfd   : > { %v239_v49 = vpop.permute.xlu2 %238 }
 0x104   : > { %v161_v53 = vpop.permute.xlu1 %160 }
 0x105   : > { %v182_v55 = vadd.f32 %v161_v53, %v102_v51  ;;  %v245_v35 = vpop.permute.xlu2 %244  ;;  %v159_v56 = vpop.permute.xlu0 %158 }
 0x106   : > { %v181_v57 = vadd.f32 %v159_v56, %v101_v54 }
 0x108   : > { %v261_v59 = vadd.f32 %v239_v49, %v181_v57  ;;  %v1165_v57 = vld [vmem:[%s1003_s21 + $0x78] sm:$0xff] }
 0x10c   : > { %v167_v61 = vpop.permute.xlu1 %166 }
 0x10d   : > { %v185_v62 = vadd.f32 %v167_v61, %v105_v60  ;;  %v251_v34 = vpop.permute.xlu2 %250  ;;  %v165_v47 = vpop.permute.xlu0 %164 }
 0x10e   : > { %v184_v63 = vadd.f32 %v165_v47, %v1016_v16 }
 0x110   : > { %v264_v0 = vadd.f32 %v245_v35, %v184_v63  ;;  %v1175_v63 = vld [vmem:[%s1003_s21 + $0x58] sm:$0xff] }
 0x115   : > { %v298_v24 = vpop.permute.xlu2 %297  ;;  %v171_v9 = vpop.permute.xlu0 %170 }
 0x116   : > { %v307_v10 = vmul.f32 %v298_v24, %v1047_v36  ;;  %v187_v11 = vadd.f32 %v171_v9, %v1056_v44 }
 0x118   : > { %330 = vrot.lane.b32.xlu1 %v307_v10, %s917_s27  ;;  %v267_v13 = vadd.f32 %v251_v34, %v187_v11 }
 0x11d   : > { %v241_v17 = vpop.permute.xlu0 %240 }
 0x11e   : > { %v262_v14 = vadd.f32 %v241_v17, %v182_v55  ;;  %v237_v15 = vpop.permute.xlu1 %236 }
 0x11f   : > { %v260_v19 = vadd.f32 %v237_v15, %v180_v40  ;;  %v1182_v15 = vld [vmem:[%s1003_s21 + $0x18] sm:$0xff] }
 0x120   : > { %365 = vperm.xlu1 %893, %v956_v2  }
 0x126   : > { %v243_v20 = vpop.permute.xlu1 %242 }
 0x127   : > { %v263_v22 = vadd.f32 %v243_v20, %v183_v43 }
 0x128   : > { %373 = vperm.xlu1 %893, %v954_v1  }
 0x12d   : > { %v247_v16 = vpop.permute.xlu0 %246 }
 0x12e   : > { %v249_v25 = vpop.permute.xlu1 %248  ;;  %v265_v26 = vadd.f32 %v247_v16, %v185_v62 }
 0x12f   : > { %v1124_v27 = vadd.f32 %v249_v25, %v186_v48 }
 0x130   : > { %385 = vperm.xlu1 %893, %v972_v7  }
 0x135   : > { %v290_v36 = vpop.permute.xlu0 %289 }
 0x136   : > { %v294_v44 = vpop.permute.xlu1 %293  ;;  %v305_v28 = vmul.f32 %v290_v36, %v1068_v52  ;;  %v321_v52 = vpop.permute.xlu2 %320 }
 0x137   : > { %v306_v29 = vmul.f32 %v294_v44, %v1050_v37  ;;  %v342_v43 = vadd.f32 %v321_v52, %v262_v14  ;;  %v920_v14 = vmov 6  }
 0x138   : > { %896 = vset.pattern.permute.xlu1 %v919_v31  ;;  %326 = vrot.lane.b32.xlu2 %v305_v28, %s917_s27 }
 0x139   : > { %413 = vperm.xlu1 %896, %v956_v2   ;;  %328 = vrot.lane.b32.xlu0 %v306_v29, %s917_s27 }
 0x13d   : > { %v317_v32 = vpop.permute.xlu0 %316 }
 0x13e   : > { %v319_v33 = vpop.permute.xlu1 %318  ;;  %v340_v38 = vadd.f32 %v317_v32, %v260_v19 }
 0x13f   : > { %v1132_v39 = vadd.f32 %v319_v33, %v261_v59 }
 0x140   : > { %357 = vperm.xlu2 %891, %v958_v3  }
 0x141   : > { %361 = vperm.xlu0 %892, %v967_v6   ;;  %421 = vperm.xlu1 %896, %v954_v1  }
 0x145   : > { %v323_v56 = vpop.permute.xlu0 %322 }
 0x146   : > { %v325_v37 = vpop.permute.xlu1 %324  ;;  %v343_v60 = vadd.f32 %v323_v56, %v263_v22 }
 0x147   : > { %v344_v51 = vadd.f32 %v325_v37, %v264_v0 }
 0x148   : > { %369 = vperm.xlu2 %891, %v965_v5  }
 0x149   : > { %381 = vperm.xlu0 %892, %v974_v8   ;;  %433 = vperm.xlu1 %896, %v972_v7  }
 0x150   : > { %377 = vperm.xlu2 %891, %v963_v4  }
 0x151   : > { %895 = vset.pattern.permute.xlu0 %v919_v31  ;;  %897 = vset.pattern.permute.xlu1 %v920_v14 }
 0x152   : > { %409 = vperm.xlu0 %895, %v967_v6  }
 0x158   : > { %894 = vset.pattern.permute.xlu2 %v919_v31 }
 0x159   : > { %405 = vperm.xlu2 %894, %v958_v3  }
 0x15a   : > { %429 = vperm.xlu0 %895, %v974_v8  }
 0x161   : > { %417 = vperm.xlu2 %894, %v965_v5  }
 0x162   : > { %899 = vset.pattern.permute.xlu0 %v920_v14 }
 0x169   : > { %425 = vperm.xlu2 %894, %v963_v4  }
 0x171   : > { %898 = vset.pattern.permute.xlu2 %v920_v14 }
 0x18a   : > { %v331_v21 = vpop.permute.xlu1 %330 }
 0x18b   : > { %v347_v40 = vadd.f32 %v331_v21, %v267_v13 }
 0x192   : > { %v366_v42 = vpop.permute.xlu1 %365  ;;  %v327_v18 = vpop.permute.xlu2 %326 }
 0x193   : > { %v390_v46 = vmul.f32 %v366_v42, %v1147_v41  ;;  %v345_v48 = vadd.f32 %v327_v18, %v265_v26  ;;  %v1189_v26 = vld [vmem:[%s1003_s21 + $0x68] sm:$0xff] }
 0x195   : > { %v1150_v49 = vadd.f32 %v390_v46, %v342_v43 }
 0x19a   : > { %v374_v30 = vpop.permute.xlu1 %373  ;;  %v358_v12 = vpop.permute.xlu2 %357 }
 0x19b   : > { %v392_v53 = vmul.f32 %v374_v30, %v1153_v50  ;;  %v388_v54 = vmul.f32 %v358_v12, %v1156_v23 }
 0x19d   : > { %v1160_v55 = vadd.f32 %v388_v54, %v340_v38  ;;  %v1162_v35 = vadd.f32 %v392_v53, %v344_v51  ;;  %v921_v51 = vmov 7  }
 0x1a2   : > { %v386_v58 = vpop.permute.xlu1 %385  ;;  %v370_v59 = vpop.permute.xlu2 %369 }
 0x1a3   : > { %v395_v61 = vmul.f32 %v386_v58, %v1165_v57  ;;  %v391_v62 = vmul.f32 %v370_v59, %v1168_v45 }
 0x1a5   : > { %v399_v34 = vadd.f32 %v391_v62, %v343_v60  ;;  %v1172_v47 = vadd.f32 %v395_v61, %v347_v40 }
 0x1aa   : > { %v378_v0 = vpop.permute.xlu2 %377 }
 0x1ab   : > { %v414_v24 = vpop.permute.xlu1 %413  ;;  %v393_v9 = vmul.f32 %v378_v0, %v1175_v63  ;;  %v329_v10 = vpop.permute.xlu0 %328 }
 0x1ac   : > { %v438_v11 = vmul.f32 %v414_v24, %v1147_v41  ;;  %v346_v13 = vadd.f32 %v329_v10, %v1124_v27 }
 0x1ad   : > { %v401_v17 = vadd.f32 %v393_v9, %v345_v48 }
 0x1ae   : > { %456 = vrot.lane.b32.xlu1 %v438_v11, %s915_s25 }
 0x1b3   : > { %v362_v19 = vpop.permute.xlu0 %361  ;;  %v406_v20 = vpop.permute.xlu2 %405 }
 0x1b4   : > { %v389_v22 = vmul.f32 %v362_v19, %v1182_v15  ;;  %v436_v16 = vmul.f32 %v406_v20, %v1156_v23 }
 0x1b6   : > { %452 = vrot.lane.b32.xlu2 %v436_v16, %s915_s25  ;;  %v397_v25 = vadd.f32 %v389_v22, %v1132_v39  ;;  %v422_v39 = vpop.permute.xlu1 %421 }
 0x1b7   : > { %v440_v52 = vmul.f32 %v422_v39, %v1153_v50 }
 0x1bb   : > { %v382_v27 = vpop.permute.xlu0 %381  ;;  %v418_v36 = vpop.permute.xlu2 %417 }
 0x1bc   : > { %v394_v44 = vmul.f32 %v382_v27, %v1189_v26  ;;  %v439_v28 = vmul.f32 %v418_v36, %v1168_v45 }
 0x1be   : > { %458 = vrot.lane.b32.xlu2 %v439_v28, %s915_s25  ;;  %v402_v29 = vadd.f32 %v394_v44, %v346_v13  ;;  %v434_v40 = vpop.permute.xlu1 %433 }
 0x1bf   : > { %v443_v42 = vmul.f32 %v434_v40, %v1165_v57 }
 0x1c3   : > { %v426_v31 = vpop.permute.xlu2 %425 }
 0x1c4   : > { %v441_v32 = vmul.f32 %v426_v31, %v1175_v63  ;;  %v410_v33 = vpop.permute.xlu0 %409 }
 0x1c5   : > { %v437_v38 = vmul.f32 %v410_v33, %v1182_v15 }
 0x1c6   : > { %462 = vrot.lane.b32.xlu1 %v441_v32, %s915_s25 }
 0x1c7   : > { %454 = vrot.lane.b32.xlu0 %v437_v38, %s915_s25 }
 0x1cc   : > { %v430_v37 = vpop.permute.xlu0 %429 }
 0x1cd   : > { %v442_v21 = vmul.f32 %v430_v37, %v1189_v26 }
 0x1ce   : > { %485 = vperm.xlu1 %897, %v958_v3  }
 0x1cf   : > { %460 = vrot.lane.b32.xlu0 %v440_v52, %s915_s25  ;;  %464 = vrot.lane.b32.xlu2 %v442_v21, %s915_s25 }
 0x1d6   : > { %497 = vperm.xlu1 %897, %v965_v5  }
 0x1d7   : > { %466 = vrot.lane.b32.xlu0 %v443_v42, %s915_s25  ;;  %489 = vperm.xlu2 %898, %v967_v6  }
 0x1de   : > { %505 = vperm.xlu1 %897, %v963_v4  }
 0x1df   : > { %493 = vperm.xlu0 %899, %v956_v2   ;;  %501 = vperm.xlu2 %898, %v954_v1  }
 0x1e6   : > { %901 = vset.pattern.permute.xlu1 %v921_v51 }
 0x1e7   : > { %513 = vperm.xlu0 %899, %v972_v7   ;;  %509 = vperm.xlu2 %898, %v974_v8  }
 0x1ef   : > { %902 = vset.pattern.permute.xlu2 %v921_v51  ;;  %900 = vset.pattern.permute.xlu0 %v921_v51 }
 0x210   : > { %v453_v18 = vpop.permute.xlu2 %452 }
 0x211   : > { %v476_v43 = vadd.f32 %v453_v18, %v1160_v55 }
 0x218   : > { %v459_v46 = vpop.permute.xlu2 %458 }
 0x219   : > { %v479_v48 = vadd.f32 %v459_v46, %v399_v34 }
 0x220   : > { %v457_v30 = vpop.permute.xlu1 %456 }
 0x221   : > { %v1214_v12 = vadd.f32 %v457_v30, %v1150_v49 }
 0x229   : > { %v465_v53 = vpop.permute.xlu2 %464 }
 0x22a   : > { %v1216_v54 = vadd.f32 %v465_v53, %v402_v29 }
 0x231   : > { %v490_v56 = vpop.permute.xlu2 %489 }
 0x232   : > { %v517_v58 = vmul.f32 %v490_v56, %v1182_v15 }
 0x234   : > { %534 = vrot.lane.b32.xlu2 %v517_v58, %s916_s26 }
 0x238   : > { %v463_v59 = vpop.permute.xlu1 %462 }
 0x239   : > { %v1220_v55 = vadd.f32 %v463_v59, %v401_v17  ;;  %v502_v60 = vpop.permute.xlu2 %501  ;;  %v455_v61 = vpop.permute.xlu0 %454 }
 0x23a   : > { %v520_v49 = vmul.f32 %v502_v60, %v1153_v50  ;;  %v477_v62 = vadd.f32 %v455_v61, %v397_v25 }
 0x23c   : > { %540 = vrot.lane.b32.xlu2 %v520_v49, %s916_s26 }
 0x240   : > { %v486_v34 = vpop.permute.xlu1 %485 }
 0x241   : > { %v516_v0 = vmul.f32 %v486_v34, %v1156_v23  ;;  %v461_v24 = vpop.permute.xlu0 %460 }
 0x242   : > { %v480_v9 = vadd.f32 %v461_v24, %v1162_v35 }
 0x243   : > { %532 = vrot.lane.b32.xlu1 %v516_v0, %s916_s26 }
 0x244   : > { %573 = vperm.xlu2 %902, %v956_v2  }
 0x248   : > { %v498_v10 = vpop.permute.xlu1 %497 }
 0x249   : > { %v519_v11 = vmul.f32 %v498_v10, %v1168_v45  ;;  %v467_v13 = vpop.permute.xlu0 %466 }
 0x24a   : > { %v1230_v17 = vadd.f32 %v467_v13, %v1172_v47 }
 0x24b   : > { %538 = vrot.lane.b32.xlu1 %v519_v11, %s916_s26 }
 0x24c   : > { %581 = vperm.xlu2 %902, %v954_v1   ;;  %v510_v1 = vpop.permute.xlu2 %509 }
 0x250   : > { %v506_v47 = vpop.permute.xlu1 %505 }
 0x251   : > { %v494_v14 = vpop.permute.xlu0 %493 }
 0x252   : > { %v518_v19 = vmul.f32 %v494_v14, %v1147_v41 }
 0x253   : > { %569 = vperm.xlu1 %901, %v967_v6   ;;  %v522_v6 = vmul.f32 %v510_v1, %v1189_v26 }
 0x254   : > { %593 = vperm.xlu2 %902, %v972_v7   ;;  %536 = vrot.lane.b32.xlu0 %v518_v19, %s916_s26  ;;  %v521_v7 = vmul.f32 %v506_v47, %v1175_v63 }
 0x259   : > { %v514_v2 = vpop.permute.xlu0 %513 }
 0x25a   : > { %v523_v35 = vmul.f32 %v514_v2, %v1165_v57 }
 0x25b   : > { %577 = vperm.xlu1 %901, %v965_v5  }
 0x25c   : > { %565 = vperm.xlu0 %900, %v958_v3   ;;  %546 = vrot.lane.b32.xlu2 %v523_v35, %s916_s26 }
 0x263   : > { %589 = vperm.xlu1 %901, %v974_v8  }
 0x264   : > { %585 = vperm.xlu0 %900, %v963_v4  }
 0x26b   : > { %544 = vrot.lane.b32.xlu1 %v522_v6, %s916_s26 }
 0x26c   : > { %542 = vrot.lane.b32.xlu0 %v521_v7, %s916_s26 }
 0x28e   : > { %v535_v20 = vpop.permute.xlu2 %534 }
 0x28f   : > { %v557_v5 = vadd.f32 %v535_v20, %v477_v62 }
 0x296   : > { %v541_v22 = vpop.permute.xlu2 %540 }
 0x297   : > { %v560_v3 = vadd.f32 %v541_v22, %v480_v9 }
 0x29e   : > { %v574_v16 = vpop.permute.xlu2 %573 }
 0x29f   : > { %v598_v25 = vmul.f32 %v574_v16, %v1147_v41 }
 0x2a1   : > { %616 = vrot.lane.b32.xlu2 %v598_v25, %s917_s27 }
 0x2a6   : > { %v582_v31 = vpop.permute.xlu2 %581 }
 0x2a7   : > { %v600_v32 = vmul.f32 %v582_v31, %v1153_v50 }
 0x2ae   : > { %v594_v39 = vpop.permute.xlu2 %593 }
 0x2af   : > { %v603_v37 = vmul.f32 %v594_v39, %v1165_v57 }
 0x2b5   : > { %v533_v4 = vpop.permute.xlu1 %532 }
 0x2b6   : > { %v556_v8 = vadd.f32 %v533_v4, %v476_v43  ;;  %v547_v40 = vpop.permute.xlu2 %546 }
 0x2b7   : > { %v563_v58 = vadd.f32 %v547_v40, %v1230_v17 }
 0x2bd   : > { %v539_v27 = vpop.permute.xlu1 %538 }
 0x2be   : > { %v559_v36 = vadd.f32 %v539_v27, %v479_v48 }
 0x2c5   : > { %v570_v44 = vpop.permute.xlu1 %569 }
 0x2c6   : > { %v597_v28 = vmul.f32 %v570_v44, %v1182_v15  ;;  %v537_v29 = vpop.permute.xlu0 %536 }
 0x2c7   : > { %v558_v42 = vadd.f32 %v537_v29, %v1214_v12 }
 0x2c8   : > { %614 = vrot.lane.b32.xlu1 %v597_v28, %s917_s27 }
 0x2cd   : > { %v578_v41 = vpop.permute.xlu1 %577 }
 0x2ce   : > { %v566_v33 = vpop.permute.xlu0 %565  ;;  %v599_v15 = vmul.f32 %v578_v41, %v1168_v45 }
 0x2cf   : > { %v596_v38 = vmul.f32 %v566_v33, %v1156_v23 }
 0x2d0   : > { %620 = vrot.lane.b32.xlu1 %v600_v32, %s917_s27 }
 0x2d1   : > { %612 = vrot.lane.b32.xlu0 %v596_v38, %s917_s27 }
 0x2d5   : > { %v590_v50 = vpop.permute.xlu1 %589 }
 0x2d6   : > { %v586_v52 = vpop.permute.xlu0 %585  ;;  %v602_v23 = vmul.f32 %v590_v50, %v1189_v26 }
 0x2d7   : > { %v601_v21 = vmul.f32 %v586_v52, %v1175_v63 }
 0x2d8   : > { %626 = vrot.lane.b32.xlu1 %v603_v37, %s917_s27 }
 0x2d9   : > { %618 = vrot.lane.b32.xlu0 %v599_v15, %s917_s27  ;;  %622 = vrot.lane.b32.xlu2 %v601_v21, %s917_s27 }
 0x2dd   : > { %v545_v63 = vpop.permute.xlu1 %544 }
 0x2de   : > { %v543_v45 = vpop.permute.xlu0 %542  ;;  %v562_v49 = vadd.f32 %v545_v63, %v1216_v54 }
 0x2df   : > { %v561_v43 = vadd.f32 %v543_v45, %v1220_v55 }
 0x2e1   : > { %624 = vrot.lane.b32.xlu0 %v602_v23, %s917_s27 }
 0x2fb   : > { %v617_v57 = vpop.permute.xlu2 %616 }
 0x2fc   : > { %v638_v18 = vadd.f32 %v617_v57, %v558_v42 }
 0x2fe   : > { %648 = vst.msk [vmem:[%s644_s28 + $0x10] sm:$0xff] %vm645_vm0, %v638_v18 }
 0x333   : > { %v623_v46 = vpop.permute.xlu2 %622 }
 0x334   : > { %v641_v48 = vadd.f32 %v623_v46, %v561_v43 }
 0x336   : > { %651 = vst.msk [vmem:[%s644_s28 + $0x28] sm:$0xff] %vm645_vm0, %v641_v48 }
 0x33a   : > { %v615_v26 = vpop.permute.xlu1 %614 }
 0x33b   : > { %v637_v30 = vadd.f32 %v615_v26, %v557_v5 }
 0x33d   : > { %647 = vst.msk [vmem:[%s644_s28 + $0x8] sm:$0xff] %vm645_vm0, %v637_v30 }
 0x342   : > { %v621_v51 = vpop.permute.xlu1 %620 }
 0x343   : > { %v640_v12 = vadd.f32 %v621_v51, %v560_v3  ;;  %v613_v53 = vpop.permute.xlu0 %612 }
 0x344   : > { %v636_v56 = vadd.f32 %v613_v53, %v556_v8 }
 0x345   : > { %650 = vst.msk [vmem:[%s644_s28 + $0x20] sm:$0xff] %vm645_vm0, %v640_v12 }
 0x346   : > { %646 = vst.msk [vmem:[%s644_s28] sm:$0xff] %vm645_vm0, %v636_v56 }
 0x34a   : > { %v627_v59 = vpop.permute.xlu1 %626 }
 0x34b   : > { %v643_v55 = vadd.f32 %v627_v59, %v563_v58  ;;  %v619_v60 = vpop.permute.xlu0 %618 }
 0x34c   : > { %v639_v61 = vadd.f32 %v619_v60, %v559_v36 }
 0x34d   : > { %653 = vst.msk [vmem:[%s644_s28 + $0x38] sm:$0xff] %vm645_vm0, %v643_v55 }
 0x34e   : > { %649 = vst.msk [vmem:[%s644_s28 + $0x18] sm:$0xff] %vm645_vm0, %v639_v61 }
 0x352   :  { %18 = sbr.rel (!%p16_p0) target bundleno = 1 (0x1), region = 81 }
 0x353   : > { %v625_v62 = vpop.permute.xlu0 %624 }
 0x354   : > { %v642_v34 = vadd.f32 %v625_v62, %v562_v49 }
 0x356   : > { %652 = vst.msk [vmem:[%s644_s28 + $0x30] sm:$0xff] %vm645_vm0, %v642_v34 }
 0x35d   :  { %v758_v0 = vld [vmem:[#allocation2] sm:$0xff]  ;;  %v760_v24 = vld [vmem:[#allocation2 + $0x8] sm:$0xff]  ;;  %v762_v9 = vld [vmem:[#allocation2 + $0x10] sm:$0xff] }
 0x35e   :  { %759 = vst [vmem:[%s1397_s3] sm:$0xff] %v758_v0  ;;  %v764_v10 = vld [vmem:[#allocation2 + $0x18] sm:$0xff]  ;;  %v766_v54 = vld [vmem:[#allocation2 + $0x20] sm:$0xff]  ;;  %v768_v11 = vld [vmem:[#allocation2 + $0x28] sm:$0xff] }
 0x35f   :  { %761 = vst [vmem:[%s1397_s3 + $0x8] sm:$0xff] %v760_v24  ;;  %v770_v13 = vld [vmem:[#allocation2 + $0x30] sm:$0xff]  ;;  %v772_v17 = vld [vmem:[#allocation2 + $0x38] sm:$0xff]  ;;  %v774_v14 = vld [vmem:[#allocation2 + $0x40] sm:$0xff] }
 0x360   :  { %763 = vst [vmem:[%s1397_s3 + $0x10] sm:$0xff] %v762_v9  ;;  %v776_v19 = vld [vmem:[#allocation2 + $0x48] sm:$0xff]  ;;  %v778_v2 = vld [vmem:[#allocation2 + $0x50] sm:$0xff]  ;;  %v780_v35 = vld [vmem:[#allocation2 + $0x58] sm:$0xff] }
 0x361   :  { %765 = vst [vmem:[%s1397_s3 + $0x18] sm:$0xff] %v764_v10  ;;  %v782_v1 = vld [vmem:[#allocation2 + $0x60] sm:$0xff]  ;;  %v784_v47 = vld [vmem:[#allocation2 + $0x68] sm:$0xff]  ;;  %v786_v6 = vld [vmem:[#allocation2 + $0x70] sm:$0xff] }
 0x362   :  { %767 = vst [vmem:[%s1397_s3 + $0x20] sm:$0xff] %v766_v54  ;;  %v788_v7 = vld [vmem:[#allocation2 + $0x78] sm:$0xff]  ;;  %v790_v20 = vld [vmem:[#allocation2 + $0x80] sm:$0xff]  ;;  %v792_v5 = vld [vmem:[#allocation2 + $0x88] sm:$0xff] }
 0x363   :  { %769 = vst [vmem:[%s1397_s3 + $0x28] sm:$0xff] %v768_v11  ;;  %v794_v22 = vld [vmem:[#allocation2 + $0x90] sm:$0xff]  ;;  %v796_v3 = vld [vmem:[#allocation2 + $0x98] sm:$0xff]  ;;  %v798_v16 = vld [vmem:[#allocation2 + $0xa0] sm:$0xff] }
 0x364   :  { %771 = vst [vmem:[%s1397_s3 + $0x30] sm:$0xff] %v770_v13  ;;  %v800_v25 = vld [vmem:[#allocation2 + $0xa8] sm:$0xff]  ;;  %v802_v4 = vld [vmem:[#allocation2 + $0xb0] sm:$0xff]  ;;  %v804_v8 = vld [vmem:[#allocation2 + $0xb8] sm:$0xff] }
 0x365   :  { %773 = vst [vmem:[%s1397_s3 + $0x38] sm:$0xff] %v772_v17  ;;  %v806_v27 = vld [vmem:[#allocation2 + $0xc0] sm:$0xff]  ;;  %v808_v36 = vld [vmem:[#allocation2 + $0xc8] sm:$0xff]  ;;  %v810_v44 = vld [vmem:[#allocation2 + $0xd0] sm:$0xff] }
 0x366   :  { %775 = vst [vmem:[%s1397_s3 + $0x40] sm:$0xff] %v774_v14  ;;  %v812_v28 = vld [vmem:[#allocation2 + $0xd8] sm:$0xff]  ;;  %v814_v29 = vld [vmem:[#allocation2 + $0xe0] sm:$0xff]  ;;  %v816_v31 = vld [vmem:[#allocation2 + $0xe8] sm:$0xff] }
 0x367   :  { %777 = vst [vmem:[%s1397_s3 + $0x48] sm:$0xff] %v776_v19  ;;  %v818_v32 = vld [vmem:[#allocation2 + $0xf0] sm:$0xff]  ;;  %v820_v33 = vld [vmem:[#allocation2 + $0xf8] sm:$0xff]  ;;  %v822_v38 = vld [vmem:[#allocation2 + $0x100] sm:$0xff] }
 0x368   :  { %779 = vst [vmem:[%s1397_s3 + $0x50] sm:$0xff] %v778_v2  ;;  %v824_v41 = vld [vmem:[#allocation2 + $0x108] sm:$0xff]  ;;  %v826_v39 = vld [vmem:[#allocation2 + $0x110] sm:$0xff]  ;;  %v828_v37 = vld [vmem:[#allocation2 + $0x118] sm:$0xff] }
 0x369   :  { %781 = vst [vmem:[%s1397_s3 + $0x58] sm:$0xff] %v780_v35  ;;  %v830_v52 = vld [vmem:[#allocation2 + $0x120] sm:$0xff]  ;;  %v832_v15 = vld [vmem:[#allocation2 + $0x128] sm:$0xff] }
 0x36a   :  { %783 = vst [vmem:[%s1397_s3 + $0x60] sm:$0xff] %v782_v1 }
 0x36b   :  { %785 = vst [vmem:[%s1397_s3 + $0x68] sm:$0xff] %v784_v47 }
 0x36c   :  { %787 = vst [vmem:[%s1397_s3 + $0x70] sm:$0xff] %v786_v6 }
 0x36d   :  { %789 = vst [vmem:[%s1397_s3 + $0x78] sm:$0xff] %v788_v7 }
 0x36e   :  { %791 = vst [vmem:[%s1397_s3 + $0x80] sm:$0xff] %v790_v20 }
 0x36f   :  { %793 = vst [vmem:[%s1397_s3 + $0x88] sm:$0xff] %v792_v5 }
 0x370   :  { %795 = vst [vmem:[%s1397_s3 + $0x90] sm:$0xff] %v794_v22 }
 0x371   :  { %797 = vst [vmem:[%s1397_s3 + $0x98] sm:$0xff] %v796_v3 }
 0x372   :  { %799 = vst [vmem:[%s1397_s3 + $0xa0] sm:$0xff] %v798_v16 }
 0x373   :  { %801 = vst [vmem:[%s1397_s3 + $0xa8] sm:$0xff] %v800_v25 }
 0x374   :  { %803 = vst [vmem:[%s1397_s3 + $0xb0] sm:$0xff] %v802_v4 }
 0x375   :  { %805 = vst [vmem:[%s1397_s3 + $0xb8] sm:$0xff] %v804_v8 }
 0x376   :  { %807 = vst [vmem:[%s1397_s3 + $0xc0] sm:$0xff] %v806_v27 }
 0x377   :  { %809 = vst [vmem:[%s1397_s3 + $0xc8] sm:$0xff] %v808_v36 }
 0x378   :  { %811 = vst [vmem:[%s1397_s3 + $0xd0] sm:$0xff] %v810_v44 }
 0x379   :  { %813 = vst [vmem:[%s1397_s3 + $0xd8] sm:$0xff] %v812_v28 }
 0x37a   :  { %815 = vst [vmem:[%s1397_s3 + $0xe0] sm:$0xff] %v814_v29 }
 0x37b   :  { %817 = vst [vmem:[%s1397_s3 + $0xe8] sm:$0xff] %v816_v31 }
 0x37c   :  { %819 = vst [vmem:[%s1397_s3 + $0xf0] sm:$0xff] %v818_v32 }
 0x37d   :  { %821 = vst [vmem:[%s1397_s3 + $0xf8] sm:$0xff] %v820_v33 }
 0x37e   :  { %823 = vst [vmem:[%s1397_s3 + $0x100] sm:$0xff] %v822_v38 }
 0x37f   :  { %825 = vst [vmem:[%s1397_s3 + $0x108] sm:$0xff] %v824_v41 }
 0x380   :  { %827 = vst [vmem:[%s1397_s3 + $0x110] sm:$0xff] %v826_v39 }
 0x381   :  { %829 = vst [vmem:[%s1397_s3 + $0x118] sm:$0xff] %v828_v37 }
 0x382   :  { %831 = vst [vmem:[%s1397_s3 + $0x120] sm:$0xff] %v830_v52 }
 0x383   :  { %833 = vst [vmem:[%s1397_s3 + $0x128] sm:$0xff] %v832_v15 }

</bundles_post_ra>
